<compile_context>
chip_gen: v5e
topology: v5e:2x2
jax: 0.10.0
libtpu: 0.0.40
codegen_flags: <defaults>
</compile_context>

<pallas_src>
import functools

import jax
import jax.numpy as jnp
from jax import lax
from jax.experimental import pallas as pl
from jax.experimental.pallas import tpu as pltpu

_NEG_BIG = jnp.float32(-1e30)


def _infonce_kernel(*refs, inv_temp, n_valid, mask_rows, has_bias):
    if has_bias:
        e1_ref, e2_ref, nat_ref, bias_ref, out_ref, m_sc, s_sc = refs
    else:
        e1_ref, e2_ref, nat_ref, out_ref, m_sc, s_sc = refs
        bias_ref = None

    i = pl.program_id(0)          # row-block axis ("parallel")
    j = pl.program_id(1)          # M-chunk axis ("arbitrary", reduction)
    block_n = e1_ref.shape[0]

    @pl.when(j == 0)
    def _():
        m_sc[...] = jnp.full(m_sc.shape, -jnp.inf, dtype=jnp.float32)
        s_sc[...] = jnp.zeros(s_sc.shape, dtype=jnp.float32)

    # Row-tile L2 normalization in f32 (rsqrt -> EUP, no divide).
    e1 = e1_ref[...].astype(jnp.float32)                       # (block_n, D)
    n1 = e1 * lax.rsqrt(1e-8 + jnp.sum(e1 * e1, axis=-1, keepdims=True))

    # MXU contraction against the pre-normalized, 1/temp-folded column tile.
    logits = jnp.dot(n1.astype(nat_ref.dtype), nat_ref[...],
                     preferred_element_type=jnp.float32)       # (block_n, bm)
    if has_bias:
        logits = logits + bias_ref[...]     # additive pad mask (0 / -1e30)

    # Online (flash-style) logsumexp over the M axis.
    m_prev = m_sc[...]
    m_new = jnp.maximum(m_prev, jnp.max(logits, axis=-1, keepdims=True))
    s_sc[...] = (s_sc[...] * jnp.exp(m_prev - m_new)
                 + jnp.sum(jnp.exp(logits - m_new), axis=-1, keepdims=True))
    m_sc[...] = m_new

    @pl.when(j == pl.num_programs(1) - 1)
    def _():
        e2 = e2_ref[...].astype(jnp.float32)
        n2 = e2 * lax.rsqrt(1e-8 + jnp.sum(e2 * e2, axis=-1, keepdims=True))
        nume = (-inv_temp) * jnp.sum(n1 * n2, axis=-1, keepdims=True)
        deno = m_sc[...] + jnp.log(s_sc[...])
        contrib = nume + deno                                  # (block_n, 1)
        if mask_rows:       # static: zero the padded rows of embeds1/embeds2
            row = i * block_n + lax.broadcasted_iota(jnp.int32, (block_n, 1), 0)
            contrib = jnp.where(row < n_valid, contrib, jnp.float32(0.0))
        bsum = jnp.sum(contrib, axis=0, keepdims=True)         # (1, 1)
        # Lane-dense (8, 128) unmasked store of the per-block partial sum.
        out_ref[...] = jnp.broadcast_to(bsum, out_ref.shape)


def infonce_loss(embeds1, embeds2, all_embeds2, temp=1.0,
                 block_n=256, block_m=2048, mxu_dtype=jnp.bfloat16):
    """Pallas implementation of InfoNCELoss.forward. Returns a scalar."""
    N, D = embeds1.shape
    M, D2 = all_embeds2.shape
    assert D == D2 and embeds2.shape == (N, D)
    inv_temp = float(1.0 / temp)

    def round_up(x, m):
        return (x + m - 1) // m * m

    # ---- tile plan ------------------------------------------------------
    N_pad8 = round_up(N, 8)
    block_n = round_up(max(8, min(int(block_n), N_pad8)), 8)
    # At least 2 steps on the parallel axis when possible (v7x: 2 TensorCores).
    if N_pad8 >= 16:
        block_n = min(block_n, round_up((N_pad8 + 1) // 2, 8))
    N_pad = round_up(N_pad8, block_n)

    M_pad128 = round_up(M, 128)
    block_m = round_up(max(128, min(int(block_m), M_pad128)), 128)
    M_pad = round_up(M_pad128, block_m)
    has_bias = M_pad > M
    mask_rows = N_pad > N

    n_blocks = N_pad // block_n
    m_blocks = M_pad // block_m
    grid = (n_blocks, m_blocks)

    # ---- wrapper-hoisted prep (single pass over all_embeds2) ------------
    a32 = all_embeds2.astype(jnp.float32)
    # 1/temp folded into the normalization factor (one fused multiply).
    na = a32 * (lax.rsqrt(1e-8 + jnp.sum(a32 * a32, axis=-1, keepdims=True))
                * inv_temp)
    na_t = na.T.astype(mxu_dtype)                               # (D, M)
    if M_pad > M:
        na_t = jnp.pad(na_t, ((0, 0), (0, M_pad - M)))

    e1 = embeds1            # original dtype; cast to f32 inside the kernel
    e2 = embeds2
    if N_pad > N:
        e1 = jnp.pad(e1, ((0, N_pad - N), (0, 0)))
        e2 = jnp.pad(e2, ((0, N_pad - N), (0, 0)))

    inputs = [e1, e2, na_t]
    in_specs = [
        pl.BlockSpec((block_n, D), lambda i, j: (i, 0)),        # embeds1 tile
        pl.BlockSpec((block_n, D), lambda i, j: (i, 0)),        # embeds2 tile
        pl.BlockSpec((D, block_m), lambda i, j: (0, j)),        # normed all^T
    ]
    if has_bias:
        bias = jnp.where(jnp.arange(M_pad) < M, 0.0, _NEG_BIG)
        bias = bias.astype(jnp.float32).reshape(1, M_pad)
        inputs.append(bias)
        in_specs.append(pl.BlockSpec((1, block_m), lambda i, j: (0, j)))

    # ---- VMEM budget -----------------------------------------------------
    bpe_in = jnp.dtype(e1.dtype).itemsize
    bpe_mx = jnp.dtype(mxu_dtype).itemsize
    est = (2 * 2 * block_n * D * bpe_in        # e1, e2 tiles (double-buffered)
           + 2 * D * block_m * bpe_mx          # na_t column tile (pipelined)
           + (2 * block_m * 4 if has_bias else 0)
           + 2 * 8 * 128 * 4                   # per-block output partial
           + 2 * block_n * 1 * 4 * 2           # m / s scratch
           + 3 * block_n * block_m * 4)        # logits + exp temporaries
    try:
        vmem_cap = int(pltpu.get_tpu_info().vmem_capacity_bytes)
    except Exception:
        vmem_cap = 64 << 20                    # conservative (v7x per-TC)
    ceiling = max(32 << 20, vmem_cap - (12 << 20))
    vmem_limit = int(min(max(est + (4 << 20), 32 << 20), ceiling))

    kernel = functools.partial(
        _infonce_kernel,
        inv_temp=inv_temp,
        n_valid=N,
        mask_rows=mask_rows,
        has_bias=has_bias,
    )

    out = pl.pallas_call(
        kernel,
        out_shape=jax.ShapeDtypeStruct((n_blocks * 8, 128), jnp.float32),
        grid_spec=pltpu.PrefetchScalarGridSpec(
            num_scalar_prefetch=0,
            grid=grid,
            in_specs=in_specs,
            out_specs=pl.BlockSpec((8, 128), lambda i, j: (i, 0)),
            scratch_shapes=[
                pltpu.VMEM((block_n, 1), jnp.float32),   # running max
                pltpu.VMEM((block_n, 1), jnp.float32),   # running sum-exp
            ],
        ),
        compiler_params=pltpu.CompilerParams(
            dimension_semantics=("parallel", "arbitrary"),
            vmem_limit_bytes=vmem_limit,
        ),
    )(*inputs)

    # Each (8,128) output tile holds its block's partial sum in every element.
    return jnp.sum(out) * (1.0 / (8 * 128))


def _infonce_ref(embeds1, embeds2, all_embeds2, temp=1.0):
    n1 = embeds1 / jnp.sqrt(1e-8 + jnp.sum(embeds1**2, -1, keepdims=True))
    n2 = embeds2 / jnp.sqrt(1e-8 + jnp.sum(embeds2**2, -1, keepdims=True))
    na = all_embeds2 / jnp.sqrt(1e-8 + jnp.sum(all_embeds2**2, -1, keepdims=True))
    nume = -jnp.sum(n1 * n2 / temp, -1)
    logits = jnp.dot(n1, na.T, precision=lax.Precision.HIGHEST) / temp
    deno = jnp.log(jnp.sum(jnp.exp(logits), -1))
    return jnp.sum(nume + deno)


if __name__ == "__main__":
    key = jax.random.PRNGKey(0)
    k1, k2, k3 = jax.random.split(key, 3)
    N, M, D = 16, 32, 64  # embeds1/embeds2: [N, D], all_embeds2: [M, D]
    embeds1 = jax.random.normal(k1, (N, D), dtype=jnp.float32)
    embeds2 = jax.random.normal(k2, (N, D), dtype=jnp.float32)
    all_embeds2 = jax.random.normal(k3, (M, D), dtype=jnp.float32)

    ref = jax.block_until_ready(_infonce_ref(embeds1, embeds2, all_embeds2, 1.0))

    def rel_err(a, b):
        return float(abs(a - b)) / max(1e-6, float(abs(b)))

    # Strict check with f32 MXU operands.
    loss_f32 = jax.block_until_ready(
        infonce_loss(embeds1, embeds2, all_embeds2, temp=1.0,
                     mxu_dtype=jnp.float32))
    assert rel_err(loss_f32, ref) < 1e-4, (loss_f32, ref)

    # Default (bf16 MXU operands) check with a bf16-appropriate tolerance.
    loss = jax.block_until_ready(
        infonce_loss(embeds1, embeds2, all_embeds2, temp=1.0))
    assert rel_err(loss, ref) < 3e-3, (loss, ref)

    print("KERNEL_OK")
</pallas_src>

<mosaic_0001>
module attributes {stable_mosaic.version = 11 : i64} {
  func.func @_infonce_kernel(%arg0: i32, %arg1: i32, %arg2: memref<8x64xf32, #tpu.memory_space<vmem>>, %arg3: memref<8x64xf32, #tpu.memory_space<vmem>>, %arg4: memref<64x128xf32, #tpu.memory_space<vmem>>, %arg5: memref<1x128xf32, #tpu.memory_space<vmem>>, %arg6: memref<8x128xf32, #tpu.memory_space<vmem>>, %arg7: memref<8x1xf32, #tpu.memory_space<vmem>>, %arg8: memref<8x1xf32, #tpu.memory_space<vmem>>) attributes {dimension_semantics = [#tpu.dimension_semantics<parallel>, #tpu.dimension_semantics<arbitrary>], iteration_bounds = array<i64: 2, 1>, scalar_prefetch = 0 : i64, scratch_operands = 2 : i64, tpu.core_type = #tpu.core_type<tc>, window_params = [{transform_indices = @transform_0, window_bounds = array<i64: 8, 64>}, {transform_indices = @transform_1, window_bounds = array<i64: 8, 64>}, {transform_indices = @transform_2, window_bounds = array<i64: 64, 128>}, {transform_indices = @transform_3, window_bounds = array<i64: 1, 128>}, {transform_indices = @transform_4, window_bounds = array<i64: 8, 128>}]} {
    %c0_i32 = arith.constant 0 : i32
    %0 = arith.cmpi eq, %arg1, %c0_i32 : i32
    %1 = arith.extui %0 : i1 to i32
    %c0_i32_0 = arith.constant 0 : i32
    %2 = arith.cmpi ne, %1, %c0_i32_0 : i32
    scf.if %2 {
      %cst_20 = arith.constant 0xFF800000 : f32
      %36 = vector.broadcast %cst_20 : f32 to vector<8x1xf32>
      %c0_21 = arith.constant 0 : index
      %c0_22 = arith.constant 0 : index
      %37 = vector.load %arg7[%c0_21, %c0_22] : memref<8x1xf32, #tpu.memory_space<vmem>>, vector<8x1xf32>
      tpu.vector_store %arg7[%c0_21, %c0_22], %36 {strides = array<i32>} : memref<8x1xf32, #tpu.memory_space<vmem>>, vector<8x1xf32>,
      %cst_23 = arith.constant 0.000000e+00 : f32
      %38 = vector.broadcast %cst_23 : f32 to vector<8x1xf32>
      %c0_24 = arith.constant 0 : index
      %c0_25 = arith.constant 0 : index
      %39 = vector.load %arg8[%c0_24, %c0_25] : memref<8x1xf32, #tpu.memory_space<vmem>>, vector<8x1xf32>
      tpu.vector_store %arg8[%c0_24, %c0_25], %38 {strides = array<i32>} : memref<8x1xf32, #tpu.memory_space<vmem>>, vector<8x1xf32>,
    } else {
    }
    %c0 = arith.constant 0 : index
    %c0_1 = arith.constant 0 : index
    %3 = vector.load %arg2[%c0, %c0_1] : memref<8x64xf32, #tpu.memory_space<vmem>>, vector<8x64xf32>
    %4 = arith.mulf %3, %3 : vector<8x64xf32>
    %cst = arith.constant dense<0.000000e+00> : vector<8xf32>
    %5 = vector.multi_reduction <add>, %4, %cst [1] : vector<8x64xf32> to vector<8xf32>
    %6 = vector.shape_cast %5 : vector<8xf32> to vector<8x1xf32>
    %cst_2 = arith.constant 9.99999993E-9 : f32
    %7 = vector.broadcast %cst_2 : f32 to vector<8x1xf32>
    %8 = arith.addf %7, %6 : vector<8x1xf32>
    %9 = math.rsqrt %8 : vector<8x1xf32>
    %10 = vector.broadcast %9 : vector<8x1xf32> to vector<8x64xf32>
    %11 = arith.mulf %3, %10 : vector<8x64xf32>
    %c0_3 = arith.constant 0 : index
    %c0_4 = arith.constant 0 : index
    %12 = vector.load %arg4[%c0_3, %c0_4] : memref<64x128xf32, #tpu.memory_space<vmem>>, vector<64x128xf32>
    %cst_5 = arith.constant dense<0.000000e+00> : vector<8x128xf32>
    %13 = tpu.matmul %11, %12, %cst_5 {dimension_numbers = #tpu.dot_dimension_numbers<[1], [0], [0], [1], [0, 0, 1, 1], [], []>} : vector<8x64xf32>, vector<64x128xf32>, vector<8x128xf32> -> vector<8x128xf32>
    %c0_6 = arith.constant 0 : index
    %c0_7 = arith.constant 0 : index
    %14 = vector.load %arg5[%c0_6, %c0_7] : memref<1x128xf32, #tpu.memory_space<vmem>>, vector<1x128xf32>
    %15 = vector.broadcast %14 : vector<1x128xf32> to vector<8x128xf32>
    %16 = arith.addf %13, %15 : vector<8x128xf32>
    %c0_8 = arith.constant 0 : index
    %c0_9 = arith.constant 0 : index
    %17 = vector.load %arg7[%c0_8, %c0_9] : memref<8x1xf32, #tpu.memory_space<vmem>>, vector<8x1xf32>
    %cst_10 = arith.constant dense<0xFF800000> : vector<8xf32>
    %18 = vector.multi_reduction <maximumf>, %16, %cst_10 [1] : vector<8x128xf32> to vector<8xf32>
    %19 = vector.shape_cast %18 : vector<8xf32> to vector<8x1xf32>
    %20 = arith.maximumf %17, %19 : vector<8x1xf32>
    %c0_11 = arith.constant 0 : index
    %c0_12 = arith.constant 0 : index
    %21 = vector.load %arg8[%c0_11, %c0_12] : memref<8x1xf32, #tpu.memory_space<vmem>>, vector<8x1xf32>
    %22 = arith.subf %17, %20 : vector<8x1xf32>
    %23 = math.exp %22 : vector<8x1xf32>
    %24 = arith.mulf %21, %23 : vector<8x1xf32>
    %25 = vector.broadcast %20 : vector<8x1xf32> to vector<8x128xf32>
    %26 = arith.subf %16, %25 : vector<8x128xf32>
    %27 = math.exp %26 : vector<8x128xf32>
    %cst_13 = arith.constant dense<0.000000e+00> : vector<8xf32>
    %28 = vector.multi_reduction <add>, %27, %cst_13 [1] : vector<8x128xf32> to vector<8xf32>
    %29 = vector.shape_cast %28 : vector<8xf32> to vector<8x1xf32>
    %30 = arith.addf %24, %29 : vector<8x1xf32>
    %c0_14 = arith.constant 0 : index
    %c0_15 = arith.constant 0 : index
    %31 = vector.load %arg8[%c0_14, %c0_15] : memref<8x1xf32, #tpu.memory_space<vmem>>, vector<8x1xf32>
    tpu.vector_store %arg8[%c0_14, %c0_15], %30 {strides = array<i32>} : memref<8x1xf32, #tpu.memory_space<vmem>>, vector<8x1xf32>,
    %c0_16 = arith.constant 0 : index
    %c0_17 = arith.constant 0 : index
    %32 = vector.load %arg7[%c0_16, %c0_17] : memref<8x1xf32, #tpu.memory_space<vmem>>, vector<8x1xf32>
    tpu.vector_store %arg7[%c0_16, %c0_17], %20 {strides = array<i32>} : memref<8x1xf32, #tpu.memory_space<vmem>>, vector<8x1xf32>,
    %c0_i32_18 = arith.constant 0 : i32
    %33 = arith.cmpi eq, %arg1, %c0_i32_18 : i32
    %34 = arith.extui %33 : i1 to i32
    %c0_i32_19 = arith.constant 0 : i32
    %35 = arith.cmpi ne, %34, %c0_i32_19 : i32
    scf.if %35 {
      %c0_20 = arith.constant 0 : index
      %c0_21 = arith.constant 0 : index
      %36 = vector.load %arg3[%c0_20, %c0_21] : memref<8x64xf32, #tpu.memory_space<vmem>>, vector<8x64xf32>
      %37 = arith.mulf %36, %36 : vector<8x64xf32>
      %cst_22 = arith.constant dense<0.000000e+00> : vector<8xf32>
      %38 = vector.multi_reduction <add>, %37, %cst_22 [1] : vector<8x64xf32> to vector<8xf32>
      %39 = vector.shape_cast %38 : vector<8xf32> to vector<8x1xf32>
      %cst_23 = arith.constant 9.99999993E-9 : f32
      %40 = vector.broadcast %cst_23 : f32 to vector<8x1xf32>
      %41 = arith.addf %40, %39 : vector<8x1xf32>
      %42 = math.rsqrt %41 : vector<8x1xf32>
      %43 = vector.broadcast %42 : vector<8x1xf32> to vector<8x64xf32>
      %44 = arith.mulf %36, %43 : vector<8x64xf32>
      %45 = arith.mulf %11, %44 : vector<8x64xf32>
      %cst_24 = arith.constant dense<0.000000e+00> : vector<8xf32>
      %46 = vector.multi_reduction <add>, %45, %cst_24 [1] : vector<8x64xf32> to vector<8xf32>
      %47 = vector.shape_cast %46 : vector<8xf32> to vector<8x1xf32>
      %cst_25 = arith.constant -1.000000e+00 : f32
      %48 = vector.broadcast %cst_25 : f32 to vector<8x1xf32>
      %49 = arith.mulf %48, %47 : vector<8x1xf32>
      %c0_26 = arith.constant 0 : index
      %c0_27 = arith.constant 0 : index
      %50 = vector.load %arg7[%c0_26, %c0_27] : memref<8x1xf32, #tpu.memory_space<vmem>>, vector<8x1xf32>
      %c0_28 = arith.constant 0 : index
      %c0_29 = arith.constant 0 : index
      %51 = vector.load %arg8[%c0_28, %c0_29] : memref<8x1xf32, #tpu.memory_space<vmem>>, vector<8x1xf32>
      %52 = math.log %51 : vector<8x1xf32>
      %53 = arith.addf %50, %52 : vector<8x1xf32>
      %54 = arith.addf %49, %53 : vector<8x1xf32>
      %cst_30 = arith.constant dense<0.000000e+00> : vector<1xf32>
      %55 = vector.multi_reduction <add>, %54, %cst_30 [0] : vector<8x1xf32> to vector<1xf32>
      %56 = vector.shape_cast %55 : vector<1xf32> to vector<1x1xf32>
      %57 = vector.shape_cast %56 : vector<1x1xf32> to vector<1x1xf32>
      %58 = vector.broadcast %57 : vector<1x1xf32> to vector<8x128xf32>
      %c0_31 = arith.constant 0 : index
      %c0_32 = arith.constant 0 : index
      %59 = vector.load %arg6[%c0_31, %c0_32] : memref<8x128xf32, #tpu.memory_space<vmem>>, vector<8x128xf32>
      tpu.vector_store %arg6[%c0_31, %c0_32], %58 {strides = array<i32>} : memref<8x128xf32, #tpu.memory_space<vmem>>, vector<8x128xf32>,
    } else {
    }
    return
  }
  func.func @transform_0(%arg0: i32, %arg1: i32) -> (i32, i32) {
    %c0_i32 = arith.constant 0 : i32
    %c0_i32_0 = arith.constant 0 : i32
    return %arg0, %c0_i32 : i32, i32
  }
  func.func @transform_1(%arg0: i32, %arg1: i32) -> (i32, i32) {
    %c0_i32 = arith.constant 0 : i32
    %c0_i32_0 = arith.constant 0 : i32
    return %arg0, %c0_i32 : i32, i32
  }
  func.func @transform_2(%arg0: i32, %arg1: i32) -> (i32, i32) {
    %c0_i32 = arith.constant 0 : i32
    %c0_i32_0 = arith.constant 0 : i32
    return %c0_i32, %arg1 : i32, i32
  }
  func.func @transform_3(%arg0: i32, %arg1: i32) -> (i32, i32) {
    %c0_i32 = arith.constant 0 : i32
    %c0_i32_0 = arith.constant 0 : i32
    return %c0_i32, %arg1 : i32, i32
  }
  func.func @transform_4(%arg0: i32, %arg1: i32) -> (i32, i32) {
    %c0_i32 = arith.constant 0 : i32
    %c0_i32_0 = arith.constant 0 : i32
    return %arg0, %c0_i32 : i32, i32
  }
}

</mosaic_0001>

<bundles_post_ra>
// kernel: tpu_custom_call.1
= control target key start
LH: loop header
LB: loop body
LE: loop exit
PB: predicated region body
PF: predicated region fallthrough
CT: control target
= control target key end

     0   :  { %s1070_s0 = inlined_call_operand.hbm [shape: f32[16,64], index: 0, kind: input, shape index: {}]   ;;  %s1071_s1 = inlined_call_operand.hbm [shape: f32[16,64], index: 1, kind: input, shape index: {}]   ;;  %s1072_s2 = inlined_call_operand.hbm [shape: f32[64,128], index: 2, kind: input, shape index: {}]   ;;  %s1073_s3 = inlined_call_operand.vmem [shape: f32[1,128], index: 3, kind: input, shape index: {}]   ;;  %s1074_s4 = inlined_call_operand.hbm [shape: f32[16,128], index: 4, kind: output, shape index: {}]  }
   0x1   :  { %1078 = sst [smem:[#allocation19_spill]] %s1072_s2 }
   0x2   :  { %9 = vsyncpa [#allocation5], 0 }
   0x3   :  { %11 = vsyncpa [#allocation5 + $0x1], 0 }
   0x4   :  { %12 = vsyncpa [#allocation8], 0 }
   0x5   :  { %14 = vsyncpa [#allocation8 + $0x1], 0 }
   0x6   :  { %15 = vsyncpa [#allocation6], 0 }
   0x7   :  { %17 = vsyncpa [#allocation6 + $0x1], 0  ;;  %s899_s15 = smov 0   ;;  %s901_s16 = smov 0  }
   0x8   :  { %s903_s17 = smov 0   ;;  %s905_s18 = smov 0  }
   0x9   :  { %s907_s19 = smov 0   ;;  %s909_s20 = smov 0  }
   0xa LB: > { %1079 = sst [smem:[#allocation15_spill]] %s854_s17  ;;  %s930_s21 = sadd.s32 4294967295, %s866_s20   ;;  %s866_s20 = sphi %s909_s20, %s23_s20   ;;  %s862_s19 = sphi %s907_s19, %s1092_s19   ;;  %s858_s18 = sphi %s905_s18, %s1091_s18   ;;  %s854_s17 = sphi %s903_s17, %s1090_s17   ;;  %s850_s16 = sphi %s901_s16, %s1094_s16   ;;  %s846_s15 = sphi %s899_s15, %s1093_s15  }
   0xb   : > { %1080 = sst [smem:[#allocation16_spill]] %s862_s19  ;;  %p572_p0 = scmp.ge.s32.totalorder %s866_s20, 1 }
   0xc   : > { %p56_p1 = scmp.eq.s32.totalorder %s930_s21, 0  ;;  %p170_p2 = scmp.lt.s32.totalorder %s866_s20, 3 }
   0xd   : > { %s1081_s2 = sld [smem:[#allocation19_spill]]  ;;  %s868_s26 = smov [#allocation9]  }
   0xe   : > { %p938_p3 = pnand %p572_p0, %p170_p2  ;;  %s185_s27 = sshll.u32 %s868_s26, 4  ;;  %s186_s27 = int_to_ptr.vmem [resolvable:$true] %s185_s27 }
   0xf   : > { %p575_p6 = scmp.ge.s32.totalorder %s866_s20, 2  ;;  %s869_s28 = smov 128  }
  0x10   : > { %p600_p4 = pneg %p938_p3  ;;  %s870_s29 = smov 8  }
  0x11   : > { %s571_s30 = sadd.s32 4294967294, %s866_s20   ;;  %s35_s5 = sadd.s32 1, %s862_s19 }
  0x12   : > { %p601_p5 = pnand %p600_p4, %p56_p1  ;;  %s42_s6 = sadd.s32 1, %s854_s17 }
  0x13   : > { %s183_s24 = sshll.u32 %s1081_s2, 4  ;;  %p37_p7 = scmp.ge.s32.totalorder %s35_s5, 2  ;;  %s184_s24 = int_to_ptr.hbm [resolvable:$true] %s183_s24 }
  0x14   : > { %603 = dma.hbm_to_vmem [thread:$0]  (!%p601_p5), %s184_s24, 1024, %s186_s27, [#allocation8], %s869_s28, %s869_s28, %s870_s29  }
  0x15   : > { %p49_p8 = scmp.ne.s32.totalorder %s854_s17, %s850_s16  ;;  %p50_p9 = scmp.eq.s32.totalorder %s866_s20, 0 }
  0x16   : > { %p55_p10 = scmp.ne.s32.totalorder %s850_s16, %s846_s15  ;;  %s1096_s5 = smov (%p37_p7, %s35_s5), 0 }
  0x17   : > { %1083 = sst [smem:[#allocation17_spill]] %s1096_s5  ;;  %p957_p11 = por %p50_p9, %p49_p8 }
  0x18   : > { %p963_p12 = por %p56_p1, %p55_p10  ;;  %s39_s9 = ssub.s32 %s862_s19, %s1096_s5 }
  0x19   : > { %p157_p13 = scmp.eq.s32.totalorder %s930_s21, 1  ;;  %p40_p0 = scmp.eq.s32.totalorder %s39_s9, 0 }
  0x1a   : > { %p163_p2 = scmp.eq.s32.totalorder %s571_s30, 1  ;;  %p616_p5 = scmp.lt.s32.totalorder %s866_s20, 2 }
  0x1b   : > { %p970_p4 = por %p157_p13, %p49_p8  ;;  %s205_s13 = sand.u32 1, %s854_s17  }
  0x1c   : > { %s976_s11 = scalar_select %p40_p0, %s854_s17, %s42_s6  }
  0x1d   : > { %p978_p7 = por %p163_p2, %p55_p10  ;;  %s576_s14 = sshll.u32 %s205_s13, 3 }
  0x1e   : > { %1087 = sst [smem:[#allocation18_spill]] %s976_s11  ;;  %s577_s22 = sshll.u32 %s862_s19, 3 }
  0x1f   : > { %s213_s26 = scalar_lea.hbm %s1070_s0, %s577_s22  ;;  %s209_s27 = scalar_lea.vmem [#allocation4], %s576_s14 }
  0x20   : > { %s217_s28 = sshll.u32 %s209_s27, 4  ;;  %s215_s29 = sshll.u32 %s213_s26, 4  ;;  %s218_s28 = int_to_ptr.vmem [resolvable:$true] %s217_s28  ;;  %s216_s29 = int_to_ptr.hbm [resolvable:$true] %s215_s29 }
  0x21   : > { %p605_p8 = pnand %p616_p5, %p957_p11  ;;  %s232_s9 = scalar_lea.hbm %s1071_s1, %s577_s22 }
  0x22   : > { %s224_s2 = sand.u32 1, %s866_s20   ;;  %s206_s5 = scalar_lea.sflag [#allocation5], %s205_s13 }
  0x23   : > { %607 = dma.hbm_to_vmem [thread:$0]  (!%p605_p8), %s216_s29, 128, %s218_s28, %s206_s5  }
  0x24   : > { %s234_s11 = sshll.u32 %s232_s9, 4  ;;  %s228_s19 = scalar_lea.vmem [#allocation7], %s576_s14  ;;  %s235_s11 = int_to_ptr.hbm [resolvable:$true] %s234_s11 }
  0x25   : > { %s236_s17 = sshll.u32 %s228_s19, 4  ;;  %s225_s23 = scalar_lea.sflag [#allocation8], %s224_s2  ;;  %s237_s17 = int_to_ptr.vmem [resolvable:$true] %s236_s17 }
  0x26   : > { %610 = dma.hbm_to_vmem [thread:$0]  (!%p605_p8), %s235_s11, 128, %s237_s17, %s225_s23  }
  0x27   : > { %245 = sbr.rel (%p938_p3) target bundleno = 872 (0x368), region = 36  ;;  %s996_s7 = sand.u32 (!%p938_p3), 1, %s850_s16  }
  0x28   : > { %s999_s22 = sshll.u32 (!%p938_p3), %s996_s7, 3  ;;  %s248_s5 = scalar_lea.sflag (!%p938_p3), [#allocation5], %s996_s7 }
  0x29   : > { %s251_s13 = scalar_lea.vmem (!%p938_p3), [#allocation4], %s999_s22 }
  0x2c   : > { %829 = dma.done.wait (%p963_p12), %s248_s5, 128  }
  0x2d   : > { %831 = vsyncadd (%p963_p12), %s248_s5, 4294967168  ;;  %s257_s2 = sand.u32 1, %s930_s21   ;;  %s261_s19 = scalar_lea.vmem [#allocation7], %s999_s22 }
  0x2e   : > { %s258_s17 = scalar_lea.sflag [#allocation8], %s257_s2 }
  0x2f   : > { %833 = dma.done.wait (%p963_p12), %s258_s17, 128  }
  0x30   : > { %835 = vsyncadd (%p963_p12), %s258_s17, 4294967168 }
  0x31   : > { %837 = dma.done.wait (%p56_p1), [#allocation8], 1024  }
  0x32   : > { %839 = vsyncadd (%p56_p1), [#allocation8], 4294966272  ;;  %v310_v0 = vld [vmem:[%s251_s13] sm:$0xff]  ;;  %vm312_vm0 = vcmask 523264   ;;  %v335_v3 = vld [vmem:[#allocation9 + $0x38] sm:$0xff]  ;;  %vm307_vm4 = vcmask 7168  }
  0x33   : > { %v311_v1 = vmul.f32 %v310_v0, %v310_v0  ;;  %351 = vmatpush.msra.mxu0 %v335_v3  ;;  %v334_v4 = vld [vmem:[#allocation9 + $0x30] sm:$0xff]  ;;  %v333_v5 = vld [vmem:[#allocation9 + $0x28] sm:$0xff]  ;;  %v332_v6 = vld [vmem:[#allocation9 + $0x20] sm:$0xff]  ;;  %v871_v21 = vmov -inf   ;;  %v872_v25 = vmov 0   ;;  %v873_v26 = vmov 0.0  }
  0x34   : > { %v331_v7 = vld [vmem:[#allocation9 + $0x18] sm:$0xff]  ;;  %v330_v8 = vld [vmem:[#allocation9 + $0x10] sm:$0xff]  ;;  %v329_v9 = vld [vmem:[#allocation9 + $0x8] sm:$0xff]  ;;  %308 = vst.msk [vmem:[#allocation2] sm:$0xff] %vm307_vm4, %v871_v21  ;;  %673 = vset.pattern.permute.xlu1 %v872_v25  ;;  %674 = vset.pattern.permute.xlu0 %v872_v25  ;;  %s587_s8 = sshll.u32 %s858_s18, 3  ;;  %s299_s26 = scalar_lea.vmem [#allocation10], %s999_s22 }
  0x35   : > { %v313_v2 = vsel %vm312_vm0, %v311_v1, 0.0  ;;  %352 = vmatpush.msra.mxu0 %v334_v4  ;;  %v328_v10 = vld [vmem:[#allocation9] sm:$0xff]  ;;  %v675_v22 = vld [vmem:[%s1073_s3] ss:$0 sm:$0xff]  ;;  %309 = vst.msk [vmem:[#allocation3] sm:$0xff] %vm307_vm4, %v873_v26  ;;  %s441_s24 = scalar_lea.hbm %s1074_s4, %s587_s8  ;;  %s443_s27 = sshll.u32 %s299_s26, 4  ;;  %s444_s27 = int_to_ptr.vmem [resolvable:$true] %s443_s27 }
  0x36   : > { %314 = vadd.xlane.f32.xlu0 %v313_v2  ;;  %v389_v31 = vld [vmem:[%s261_s19] sm:$0xff]  ;;  %s445_s28 = sshll.u32 %s441_s24, 4  ;;  %s431_s29 = scalar_lea.sflag [#allocation6], %s996_s7  ;;  %s446_s28 = int_to_ptr.hbm [resolvable:$true] %s445_s28 }
  0x37   : > { %353 = vmatpush.msra.mxu0 %v333_v5  ;;  %v390_v32 = vmul.f32 %v389_v31, %v389_v31  ;;  %s790_s30 = sshra.s32 %s446_s28, 4  ;;  %s796_s23 = scalar_lea.hbm %s1074_s4, 16  ;;  %s791_s30 = int_to_ptr.hbm [resolvable:$true] %s790_s30 }
  0x38   : > { %s792_s6 = scalar_lea.hbm %s791_s30, 8  ;;  %p797_p10 = scmp.lt.s32.totalorder %s791_s30, %s1074_s4 }
  0x39   : > { %354 = vmatpush.msra.mxu0 %v332_v6  ;;  %v391_v33 = vsel %vm312_vm0, %v390_v32, 0.0  ;;  %p793_p1 = scmp.ne.s32.totalorder %s791_s30, %s792_s6  ;;  %p798_p11 = scmp.lt.s32.totalorder %s796_s23, %s792_s6 }
  0x3b   : > { %355 = vmatpush.msra.mxu0 %v331_v7  ;;  %v363_v27 = vld [vmem:[#allocation2] sm:$0xff]  ;;  %p794_p3 = pnand %p793_p1, %p970_p4  ;;  %p799_p12 = por %p798_p11, %p797_p10 }
  0x3c   : > { %v367_v52 = vld [vmem:[#allocation3] sm:$0xff] }
  0x3d   : > { %356 = vmatpush.msra.mxu0 %v330_v8  ;;  %p795_p9 = pneg %p794_p3 }
  0x3f   : > { %357 = vmatpush.msra.mxu0 %v329_v9  ;;  %p800_p13 = pnand %p799_p12, %p795_p9 }
  0x41   : > { %358 = vmatpush.msra.mxu0 %v328_v10 }
  0xa9   : > { %v315_v11 = vpop.xlane.xlu0 %314 }
  0xaa   : > { %v316_v12 = vadd.f32 1e-08, %v315_v11 }
  0xac   : > { %676 = vrsqrt.f32 %v316_v12  ;;  %vm323_vm2 = vweird.f32 %v316_v12 }
  0xb2   : > { %v677_v13 = vpop.eup %676 }
  0xb3   : > { %v318_v14 = vmul.f32 %v677_v13, %v316_v12  ;;  %vm324_vm1 = vweird.f32 %v677_v13 }
  0xb4   : > { %vm325_vm3 = vmor %vm323_vm2, %vm324_vm1 }
  0xb5   : > { %v319_v15 = vmul.f32 %v677_v13, %v318_v14 }
  0xb7   : > { %v320_v16 = vmul.f32 0.5, %v319_v15 }
  0xb9   : > { %v321_v17 = vsub.f32 1.5, %v320_v16 }
  0xbb   : > { %v322_v18 = vmul.f32 %v677_v13, %v321_v17 }
  0xbd   : > { %v326_v19 = vsel %vm325_vm3, %v677_v13, %v322_v18 }
  0xbe   : > { %v327_v20 = vmul.f32 %v326_v19, %v310_v0 }
  0xc0   : > { %585 = vmatmul.msk.f32.vlgmr.msra.gmra.mxu0 %vm312_vm0, %v327_v20 }
 0x13d   : > { %v360_v23 = vpop.f32.mrf.mxu0 }
 0x13e   : > { %v361_v24 = vadd.f32 %v675_v22, %v360_v23 }
 0x140   : > { %364 = vmax.xlane.f32.xlu0 %v361_v24 }
 0x1b3   : > { %v365_v28 = vpop.xlane.xlu0 %364 }
 0x1b4   : > { %v366_v29 = vmax.f32 %v363_v27, %v365_v28 }
 0x1b6   : > { %v368_v30 = vsub.f32 %v363_v27, %v366_v29  ;;  %385 = vst.msk [vmem:[#allocation2] sm:$0xff] %vm307_vm4, %v366_v29  ;;  %374 = vperm.xlu1 %673, %v366_v29  }
 0x1b8   : > { %v369_v50 = vmul.f32 1.442695, %v368_v30 }
 0x1bd   : > { %v411_v60 = vld [vmem:[#allocation2] sm:$0xff] }
 0x1e0   : > { %392 = vadd.xlane.f32.xlu1 %v391_v33 }
 0x228   : > { %v375_v34 = vpop.permute.xlu1 %374 }
 0x229   : > { %v377_v35 = vsub.f32 %v361_v24, %v375_v34 }
 0x22b   : > { %v378_v36 = vmul.f32 1.442695, %v377_v35 }
 0x22d   : > { %678 = vpow2.f32 %v378_v36 }
 0x233   : > { %v679_v37 = vpop.eup %678 }
 0x234   : > { %380 = vadd.xlane.f32.xlu2 %v679_v37 }
 0x253   : > { %v393_v38 = vpop.xlane.xlu1 %392 }
 0x254   : > { %v394_v39 = vadd.f32 1e-08, %v393_v38 }
 0x256   : > { %680 = vrsqrt.f32 %v394_v39  ;;  %vm401_vm6 = vweird.f32 %v394_v39 }
 0x257   : > { %682 = vpow2.f32 %v369_v50 }
 0x25c   : > { %v681_v40 = vpop.eup %680 }
 0x25d   : > { %v396_v41 = vmul.f32 %v681_v40, %v394_v39  ;;  %vm402_vm5 = vweird.f32 %v681_v40  ;;  %v683_v51 = vpop.eup %682 }
 0x25e   : > { %vm403_vm7 = vmor %vm401_vm6, %vm402_vm5  ;;  %v371_v53 = vmul.f32 %v683_v51, %v367_v52 }
 0x25f   : > { %v397_v42 = vmul.f32 %v681_v40, %v396_v41 }
 0x261   : > { %v398_v43 = vmul.f32 0.5, %v397_v42 }
 0x263   : > { %v399_v44 = vsub.f32 1.5, %v398_v43 }
 0x265   : > { %v400_v45 = vmul.f32 %v681_v40, %v399_v44 }
 0x267   : > { %v404_v46 = vsel %vm403_vm7, %v681_v40, %v400_v45 }
 0x268   : > { %v405_v47 = vmul.f32 %v404_v46, %v389_v31 }
 0x26a   : > { %v406_v48 = vmul.f32 %v405_v47, %v327_v20 }
 0x26c   : > { %v407_v49 = vsel %vm312_vm0, %v406_v48, 0.0 }
 0x26d   : > { %408 = vadd.xlane.f32.xlu2 %v407_v49 }
 0x2a7   : > { %v381_v54 = vpop.xlane.xlu2 %380 }
 0x2a8   : > { %v382_v55 = vadd.f32 %v381_v54, %v371_v53 }
 0x2aa   : > { %384 = vst.msk [vmem:[#allocation3] sm:$0xff] %vm307_vm4, %v382_v55 }
 0x2b1   : > { %v412_v56 = vld [vmem:[#allocation3] sm:$0xff] }
 0x2b2   : > { %684 = vlog2.f32 %v412_v56 }
 0x2b8   : > { %v685_v57 = vpop.eup %684 }
 0x2b9   : > { %v414_v58 = vmul.f32 0.6931472, %v685_v57 }
 0x2bb   : > { %v415_v62 = vadd.f32 %v414_v58, %v411_v60 }
 0x2e0   : > { %v409_v59 = vpop.xlane.xlu2 %408 }
 0x2e1   : > { %v410_v61 = vmul.f32 -1.0, %v409_v59 }
 0x2e3   : > { %v416_v63 = vadd.f32 %v415_v62, %v410_v61 }
 0x2e5   : > { %v417_v0 = vsel %vm307_vm4, %v416_v63, 0.0 }
 0x2e6   : > { %v418_v1 = vrot.slane %v417_v0, 4 }
 0x2e8   : > { %v419_v2 = vadd.f32 %v418_v1, %v417_v0 }
 0x2ea   : > { %v420_v3 = vrot.slane %v419_v2, 2 }
 0x2ec   : > { %v421_v4 = vadd.f32 %v420_v3, %v419_v2 }
 0x2ee   : > { %v422_v5 = vrot.slane %v421_v4, 1 }
 0x2f0   : > { %v423_v6 = vadd.f32 %v422_v5, %v421_v4 }
 0x2f2   : > { %426 = vperm.xlu0 %674, %v423_v6  }
 0x364   : > { %v427_v7 = vpop.permute.xlu0 %426 }
 0x365   : > { %429 = vst [vmem:[%s299_s26] sm:$0xff] %v427_v7 }
 0x366   : > { %803 = shalt.err (!%p800_p13)
}
 0x367   : > { %598 = dma.vmem_to_hbm [thread:$0]  (%p970_p4), %s444_s27, 128, %s446_s28, %s431_s29  }
 0x368 PF: > { %s457_s7 = sand.u32 1, %s846_s15   ;;  %p612_p0 = pnand %p575_p6, %p978_p7 }
 0x369   : > { %s458_s13 = scalar_lea.sflag [#allocation6], %s457_s7 }
 0x36a   : > { %p613_p2 = pneg %p612_p0 }
 0x36c   : > { %841 = dma.done.wait (%p613_p2), %s458_s13, 128  }
 0x36d   : > { %843 = vsyncadd (%p613_p2), %s458_s13, 4294967168  ;;  %s23_s20 = sadd.s32 1, %s866_s20   ;;  %s1089_s2 = sld [smem:[#allocation15_spill]] }
 0x36e   : > { %p20_p5 = scmp.ge.s32.totalorder %s23_s20, 4   ;;  %s1090_s17 = sld [smem:[#allocation18_spill]] }
 0x36f   : > { %s1091_s18 = sld [smem:[#allocation16_spill]]  ;;  %s1093_s15 = smov %s850_s16 }
 0x370   : > { %s1092_s19 = sld [smem:[#allocation17_spill]]  ;;  %22 = sbr.rel (!%p20_p5) target bundleno = 10 (0xa), region = 110 }
 0x373   : > { %s1094_s16 = smov %s1089_s2 }
 0x375   :  { %464 = vsyncpa [#allocation5], 1 }
 0x376   :  { %466 = vsyncpa [#allocation5 + $0x1], 1 }
 0x377   :  { %467 = vsyncpa [#allocation8], 1 }
 0x378   :  { %469 = vsyncpa [#allocation8 + $0x1], 1 }
 0x379   :  { %470 = vsyncpa [#allocation6], 1 }
 0x37a   :  { %472 = vsyncpa [#allocation6 + $0x1], 1 }

</bundles_post_ra>
